<compile_context>
chip_gen: v7x
topology: tpu7x:2x2x1
jax: 0.10.0
libtpu: 0.0.40
codegen_flags: <defaults>
</compile_context>

<pallas_src>
import jax
import jax.numpy as jnp
from jax.experimental import pallas as pl
from jax.experimental.pallas import tpu as pltpu


# ----------------------------------------------------------------------------
# Small helpers
# ----------------------------------------------------------------------------
def _round_up(n: int, m: int) -> int:
    return ((n + m - 1) // m) * m


def _sublane(dtype) -> int:
    """Sublane multiple per dtype: 8 rows (4B), 16 rows (2B), 32 rows (1B)."""
    return max(8, 32 // jnp.dtype(dtype).itemsize)


def _supports_single_buffering() -> bool:
    try:
        pl.BlockSpec((8, 128), lambda i: (0, 0), pipeline_mode=pl.Buffered(1))
        return True
    except Exception:
        return False


_SINGLE_BUFFER_OK = _supports_single_buffering()


def _resident_spec(shape):
    """Constant-index (VMEM-resident) block; single-buffered when supported
    since its index_map never changes across the grid."""
    index_map = lambda i: (0,) * len(shape)
    if _SINGLE_BUFFER_OK:
        return pl.BlockSpec(shape, index_map, pipeline_mode=pl.Buffered(1))
    return pl.BlockSpec(shape, index_map)


def _pick_tb(batch: int, block_b: int, sublane: int, min_grid_steps: int) -> int:
    """Batch-tile size: sublane-rounded, capped by block_b, and shrunk when a
    single grid step would cover all of B (so v7x's two TCs both get work)."""
    tb = min(block_b, _round_up(batch, sublane))
    if (min_grid_steps > 1 and pl.cdiv(batch, tb) < min_grid_steps
            and batch > sublane):
        tb = max(sublane, _round_up(pl.cdiv(batch, min_grid_steps), sublane))
    return tb


_COMPILER_PARAMS = pltpu.CompilerParams(
    dimension_semantics=("parallel",),
    vmem_limit_bytes=32 * 1024 * 1024,   # >= v5e's 16 MiB scoped default,
)                                         # <= v7x's 64 MiB physical VMEM.


# ----------------------------------------------------------------------------
# One-time parameter preparation (run after each optimizer update, NOT per call)
# ----------------------------------------------------------------------------
def prepare_params(params, state_dim, *, compute_dtype=jnp.float32):
    """Split W1 into state/action halves, zero-pad hidden dim to a lane-dense
    128 and cast matmul weights to `compute_dtype` (biases / head stay f32).
    Zero-padding is exact: the math is unchanged."""
    w1, b1, w2, b2, w3, b3 = params
    S = state_dim
    H = w1.shape[1]
    Hp = _round_up(H, 128)
    ph = Hp - H
    w1_s = jnp.pad(w1[:S], ((0, 0), (0, ph))).astype(compute_dtype)   # (S, Hp)
    w1_a = jnp.pad(w1[S:], ((0, 0), (0, ph))).astype(compute_dtype)   # (A, Hp)
    b1_p = jnp.pad(b1.reshape(1, H), ((0, 0), (0, ph))).astype(jnp.float32)
    w2_p = jnp.pad(w2, ((0, ph), (0, ph))).astype(compute_dtype)      # (Hp, Hp)
    b2_p = jnp.pad(b2.reshape(1, H), ((0, 0), (0, ph))).astype(jnp.float32)
    w3_r = jnp.pad(w3.reshape(1, H), ((0, 0), (0, ph))).astype(jnp.float32)
    b3_p = b3.reshape(1, 1).astype(jnp.float32)
    return (w1_s, w1_a, b1_p, w2_p, b2_p, w3_r, b3_p)


def prepare_twin_params(params_q1, params_q2, state_dim, *,
                        compute_dtype=jnp.float32):
    """Stack two prepared critic parameter sets along a leading axis of 2."""
    p1 = prepare_params(params_q1, state_dim, compute_dtype=compute_dtype)
    p2 = prepare_params(params_q2, state_dim, compute_dtype=compute_dtype)
    return tuple(jnp.stack([a, b]) for a, b in zip(p1, p2))


# ----------------------------------------------------------------------------
# Kernels
# ----------------------------------------------------------------------------
def _qnet_kernel(s_ref, a_ref, w1s_ref, w1a_ref, b1_ref, w2_ref, b2_ref,
                 w3_ref, b3_ref, out_ref):
    cdt = w1s_ref.dtype                   # compute dtype chosen at prep time
    s = s_ref[...].astype(cdt)            # in-kernel cast: no extra HBM pass
    a = a_ref[...].astype(cdt)

    # Layer 1: split matmul (state/action) replaces the host-side concat.
    h1 = jnp.dot(s, w1s_ref[...], preferred_element_type=jnp.float32)
    h1 = h1 + jnp.dot(a, w1a_ref[...], preferred_element_type=jnp.float32)
    h1 = jnp.maximum(h1 + b1_ref[...], 0.0)        # bias/ReLU in f32 (VPU)

    # Layer 2: (TB, 128) @ (128, 128) lane-dense MXU work.
    h2 = jnp.dot(h1.astype(cdt), w2_ref[...],
                 preferred_element_type=jnp.float32)
    h2 = jnp.maximum(h2 + b2_ref[...], 0.0)

    # Layer 3: N=1 head -> VPU multiply + XLU lane reduce (MXU path stays free).
    q = jnp.sum(h2 * w3_ref[...], axis=-1, keepdims=True) + b3_ref[...]
    out_ref[...] = q.astype(out_ref.dtype)


def _twin_qnet_kernel(s_ref, a_ref, w1s_ref, w1a_ref, b1_ref, w2_ref, b2_ref,
                      w3_ref, b3_ref, q1_ref, q2_ref):
    cdt = w1s_ref.dtype
    s = s_ref[...].astype(cdt)            # activations read from HBM ONCE,
    a = a_ref[...].astype(cdt)            # reused by both critic heads.

    def head(c, out_ref):                 # c is a static Python index
        h1 = jnp.dot(s, w1s_ref[c], preferred_element_type=jnp.float32)
        h1 = h1 + jnp.dot(a, w1a_ref[c], preferred_element_type=jnp.float32)
        h1 = jnp.maximum(h1 + b1_ref[c], 0.0)
        h2 = jnp.dot(h1.astype(cdt), w2_ref[c],
                     preferred_element_type=jnp.float32)
        h2 = jnp.maximum(h2 + b2_ref[c], 0.0)
        q = jnp.sum(h2 * w3_ref[c], axis=-1, keepdims=True) + b3_ref[c]
        out_ref[...] = q.astype(out_ref.dtype)

    head(0, q1_ref)
    head(1, q2_ref)


# ----------------------------------------------------------------------------
# Wrappers
# ----------------------------------------------------------------------------
def qnetwork_forward(state, action, prepared, *, block_b=2048,
                     min_grid_steps=2):
    """QNetwork.forward: state (B, S), action (B, A) -> q (B, 1).
    `prepared` is the output of prepare_params(); reuse it across calls."""
    w1_s, w1_a, b1_p, w2_p, b2_p, w3_r, b3_p = prepared
    B, S = state.shape
    A = action.shape[1]
    Hp = w1_s.shape[1]
    assert w1_s.shape[0] == S and w1_a.shape[0] == A

    TB = _pick_tb(B, block_b, _sublane(w1_s.dtype), min_grid_steps)
    grid = (pl.cdiv(B, TB),)

    def batch_spec(feat):
        return pl.BlockSpec((TB, feat), lambda i: (i, 0))

    return pl.pallas_call(
        _qnet_kernel,
        out_shape=jax.ShapeDtypeStruct((B, 1), jnp.float32),
        grid=grid,
        in_specs=[
            batch_spec(S),                 # state tile   (double-buffered)
            batch_spec(A),                 # action tile  (double-buffered)
            _resident_spec((S, Hp)),       # w1_s         (resident, 1 buffer)
            _resident_spec((A, Hp)),       # w1_a
            _resident_spec((1, Hp)),       # b1
            _resident_spec((Hp, Hp)),      # w2
            _resident_spec((1, Hp)),       # b2
            _resident_spec((1, Hp)),       # w3 row
            _resident_spec((1, 1)),        # b3
        ],
        out_specs=pl.BlockSpec((TB, 1), lambda i: (i, 0)),
        compiler_params=_COMPILER_PARAMS,
    )(state, action, w1_s, w1_a, b1_p, w2_p, b2_p, w3_r, b3_p)


def twin_qnetwork_forward(state, action, prepared_twin, *, block_b=2048,
                          min_grid_steps=2):
    """SAC twin critics fused in one pallas_call -> (q1, q2), each (B, 1)."""
    w1_s, w1_a, b1_p, w2_p, b2_p, w3_r, b3_p = prepared_twin
    B, S = state.shape
    A = action.shape[1]
    Hp = w1_s.shape[2]
    assert w1_s.shape == (2, S, Hp) and w1_a.shape == (2, A, Hp)

    TB = _pick_tb(B, block_b, _sublane(w1_s.dtype), min_grid_steps)
    grid = (pl.cdiv(B, TB),)

    def batch_spec(feat):
        return pl.BlockSpec((TB, feat), lambda i: (i, 0))

    out_spec = pl.BlockSpec((TB, 1), lambda i: (i, 0))
    out_shape = jax.ShapeDtypeStruct((B, 1), jnp.float32)

    return pl.pallas_call(
        _twin_qnet_kernel,
        out_shape=(out_shape, out_shape),
        grid=grid,
        in_specs=[
            batch_spec(S),                 # state tile (shared by both heads)
            batch_spec(A),                 # action tile
            _resident_spec((2, S, Hp)),    # stacked w1_s
            _resident_spec((2, A, Hp)),    # stacked w1_a
            _resident_spec((2, 1, Hp)),    # stacked b1
            _resident_spec((2, Hp, Hp)),   # stacked w2
            _resident_spec((2, 1, Hp)),    # stacked b2
            _resident_spec((2, 1, Hp)),    # stacked w3 rows
            _resident_spec((2, 1, 1)),     # stacked b3
        ],
        out_specs=(out_spec, out_spec),
        compiler_params=_COMPILER_PARAMS,
    )(state, action, w1_s, w1_a, b1_p, w2_p, b2_p, w3_r, b3_p)


# ----------------------------------------------------------------------------
# Init + reference (PyTorch semantics)
# ----------------------------------------------------------------------------
def init_qnetwork_params(key, state_dim, action_dim, hidden_dim=64):
    """PyTorch-style init: U(-1/sqrt(fan_in), +1/sqrt(fan_in))."""
    in_dim = state_dim + action_dim
    keys = jax.random.split(key, 6)

    def lin(kw, kb, fan_in, fan_out):
        bound = 1.0 / jnp.sqrt(float(fan_in))
        w = jax.random.uniform(kw, (fan_in, fan_out), jnp.float32, -bound, bound)
        b = jax.random.uniform(kb, (1, fan_out), jnp.float32, -bound, bound)
        return w, b

    w1, b1 = lin(keys[0], keys[1], in_dim, hidden_dim)
    w2, b2 = lin(keys[2], keys[3], hidden_dim, hidden_dim)
    w3, b3 = lin(keys[4], keys[5], hidden_dim, 1)
    return (w1, b1, w2, b2, w3, b3)


def _reference_forward(state, action, params):
    w1, b1, w2, b2, w3, b3 = params
    x = jnp.concatenate([state, action], axis=1)
    h1 = jnp.maximum(x @ w1 + b1, 0.0)
    h2 = jnp.maximum(h1 @ w2 + b2, 0.0)
    return h2 @ w3 + b3


# ----------------------------------------------------------------------------
# Self-test
# ----------------------------------------------------------------------------
if __name__ == "__main__":
    key = jax.random.PRNGKey(0)
    k_s, k_a, k_p1, k_p2, k_s2, k_a2, k_s3, k_a3 = jax.random.split(key, 8)

    batch, state_dim, action_dim, hidden_dim = 8, 12, 4, 64

    state = jax.random.normal(k_s, (batch, state_dim), jnp.float32)
    action = jax.random.normal(k_a, (batch, action_dim), jnp.float32)
    params = init_qnetwork_params(k_p1, state_dim, action_dim, hidden_dim)
    params2 = init_qnetwork_params(k_p2, state_dim, action_dim, hidden_dim)

    # One-time prep (re-run after each optimizer step in SAC, not per forward).
    prep_f32 = prepare_params(params, state_dim)
    prep_bf16 = prepare_params(params, state_dim, compute_dtype=jnp.bfloat16)
    prep_twin = prepare_twin_params(params, params2, state_dim)

    # 1) f32 path, single batch tile.
    q = qnetwork_forward(state, action, prep_f32)
    jax.block_until_ready(q)
    q_ref = _reference_forward(state, action, params)
    assert q.shape == (batch, 1)
    assert jnp.allclose(q, q_ref, atol=1e-4, rtol=1e-4)

    # 2) Multi-tile grid with a ragged last block.
    batch2 = 40
    state2 = jax.random.normal(k_s2, (batch2, state_dim), jnp.float32)
    action2 = jax.random.normal(k_a2, (batch2, action_dim), jnp.float32)
    q2 = qnetwork_forward(state2, action2, prep_f32, block_b=16)
    jax.block_until_ready(q2)
    q2_ref = _reference_forward(state2, action2, params)
    assert q2.shape == (batch2, 1)
    assert jnp.allclose(q2, q2_ref, atol=1e-4, rtol=1e-4)

    # 3) bf16 MXU feed (in-kernel cast, f32 accumulation, sublane-16 TB,
    #    auto-split into >=2 grid steps) — looser tolerance.
    q3 = qnetwork_forward(state2, action2, prep_bf16)
    jax.block_until_ready(q3)
    assert jnp.allclose(q3, q2_ref, atol=5e-2, rtol=5e-2)

    # 4) Batch smaller than one sublane group (block bigger than the array).
    batch3 = 5
    state3 = jax.random.normal(k_s3, (batch3, state_dim), jnp.float32)
    action3 = jax.random.normal(k_a3, (batch3, action_dim), jnp.float32)
    q4 = qnetwork_forward(state3, action3, prep_f32)
    jax.block_until_ready(q4)
    q4_ref = _reference_forward(state3, action3, params)
    assert q4.shape == (batch3, 1)
    assert jnp.allclose(q4, q4_ref, atol=1e-4, rtol=1e-4)

    # 5) Fused twin critics: one pallas_call, activations read from HBM once.
    q1_t, q2_t = twin_qnetwork_forward(state2, action2, prep_twin, block_b=16)
    jax.block_until_ready((q1_t, q2_t))
    assert jnp.allclose(q1_t, q2_ref, atol=1e-4, rtol=1e-4)
    assert jnp.allclose(q2_t, _reference_forward(state2, action2, params2),
                        atol=1e-4, rtol=1e-4)

    print("KERNEL_OK")
</pallas_src>

<mosaic_0001>
module attributes {stable_mosaic.version = 11 : i64} {
  func.func @_qnet_kernel(%arg0: i32, %arg1: memref<8x12xf32, #tpu.memory_space<vmem>>, %arg2: memref<8x4xf32, #tpu.memory_space<vmem>>, %arg3: memref<12x128xf32, #tpu.memory_space<vmem>>, %arg4: memref<4x128xf32, #tpu.memory_space<vmem>>, %arg5: memref<1x128xf32, #tpu.memory_space<vmem>>, %arg6: memref<128x128xf32, #tpu.memory_space<vmem>>, %arg7: memref<1x128xf32, #tpu.memory_space<vmem>>, %arg8: memref<1x128xf32, #tpu.memory_space<vmem>>, %arg9: memref<1x1xf32, #tpu.memory_space<vmem>>, %arg10: memref<8x1xf32, #tpu.memory_space<vmem>>) attributes {dimension_semantics = [#tpu.dimension_semantics<parallel>], iteration_bounds = array<i64: 1>, scalar_prefetch = 0 : i64, scratch_operands = 0 : i64, tpu.core_type = #tpu.core_type<tc>, window_params = [{transform_indices = @transform_0, window_bounds = array<i64: 8, 12>}, {transform_indices = @transform_1, window_bounds = array<i64: 8, 4>}, {pipeline_mode = #tpu.pipeline_mode<synchronous>, transform_indices = @transform_2, window_bounds = array<i64: 12, 128>}, {pipeline_mode = #tpu.pipeline_mode<synchronous>, transform_indices = @transform_3, window_bounds = array<i64: 4, 128>}, {pipeline_mode = #tpu.pipeline_mode<synchronous>, transform_indices = @transform_4, window_bounds = array<i64: 1, 128>}, {pipeline_mode = #tpu.pipeline_mode<synchronous>, transform_indices = @transform_5, window_bounds = array<i64: 128, 128>}, {pipeline_mode = #tpu.pipeline_mode<synchronous>, transform_indices = @transform_6, window_bounds = array<i64: 1, 128>}, {pipeline_mode = #tpu.pipeline_mode<synchronous>, transform_indices = @transform_7, window_bounds = array<i64: 1, 128>}, {pipeline_mode = #tpu.pipeline_mode<synchronous>, transform_indices = @transform_8, window_bounds = array<i64: 1, 1>}, {transform_indices = @transform_9, window_bounds = array<i64: 8, 1>}]} {
    %c0 = arith.constant 0 : index
    %c0_0 = arith.constant 0 : index
    %0 = vector.load %arg1[%c0, %c0_0] : memref<8x12xf32, #tpu.memory_space<vmem>>, vector<8x12xf32>
    %c0_1 = arith.constant 0 : index
    %c0_2 = arith.constant 0 : index
    %1 = vector.load %arg2[%c0_1, %c0_2] : memref<8x4xf32, #tpu.memory_space<vmem>>, vector<8x4xf32>
    %c0_3 = arith.constant 0 : index
    %c0_4 = arith.constant 0 : index
    %2 = vector.load %arg3[%c0_3, %c0_4] : memref<12x128xf32, #tpu.memory_space<vmem>>, vector<12x128xf32>
    %cst = arith.constant dense<0.000000e+00> : vector<8x128xf32>
    %3 = tpu.matmul %0, %2, %cst {dimension_numbers = #tpu.dot_dimension_numbers<[1], [0], [0], [1], [0, 0, 1, 1], [], []>} : vector<8x12xf32>, vector<12x128xf32>, vector<8x128xf32> -> vector<8x128xf32>
    %c0_5 = arith.constant 0 : index
    %c0_6 = arith.constant 0 : index
    %4 = vector.load %arg4[%c0_5, %c0_6] : memref<4x128xf32, #tpu.memory_space<vmem>>, vector<4x128xf32>
    %cst_7 = arith.constant dense<0.000000e+00> : vector<8x128xf32>
    %5 = tpu.matmul %1, %4, %cst_7 {dimension_numbers = #tpu.dot_dimension_numbers<[1], [0], [0], [1], [0, 0, 1, 1], [], []>} : vector<8x4xf32>, vector<4x128xf32>, vector<8x128xf32> -> vector<8x128xf32>
    %6 = arith.addf %3, %5 : vector<8x128xf32>
    %c0_8 = arith.constant 0 : index
    %c0_9 = arith.constant 0 : index
    %7 = vector.load %arg5[%c0_8, %c0_9] : memref<1x128xf32, #tpu.memory_space<vmem>>, vector<1x128xf32>
    %8 = vector.broadcast %7 : vector<1x128xf32> to vector<8x128xf32>
    %9 = arith.addf %6, %8 : vector<8x128xf32>
    %cst_10 = arith.constant 0.000000e+00 : f32
    %10 = vector.broadcast %cst_10 : f32 to vector<8x128xf32>
    %11 = arith.maximumf %9, %10 : vector<8x128xf32>
    %c0_11 = arith.constant 0 : index
    %c0_12 = arith.constant 0 : index
    %12 = vector.load %arg6[%c0_11, %c0_12] : memref<128x128xf32, #tpu.memory_space<vmem>>, vector<128x128xf32>
    %cst_13 = arith.constant dense<0.000000e+00> : vector<8x128xf32>
    %13 = tpu.matmul %11, %12, %cst_13 {dimension_numbers = #tpu.dot_dimension_numbers<[1], [0], [0], [1], [0, 0, 1, 1], [], []>} : vector<8x128xf32>, vector<128x128xf32>, vector<8x128xf32> -> vector<8x128xf32>
    %c0_14 = arith.constant 0 : index
    %c0_15 = arith.constant 0 : index
    %14 = vector.load %arg7[%c0_14, %c0_15] : memref<1x128xf32, #tpu.memory_space<vmem>>, vector<1x128xf32>
    %15 = vector.broadcast %14 : vector<1x128xf32> to vector<8x128xf32>
    %16 = arith.addf %13, %15 : vector<8x128xf32>
    %cst_16 = arith.constant 0.000000e+00 : f32
    %17 = vector.broadcast %cst_16 : f32 to vector<8x128xf32>
    %18 = arith.maximumf %16, %17 : vector<8x128xf32>
    %c0_17 = arith.constant 0 : index
    %c0_18 = arith.constant 0 : index
    %19 = vector.load %arg8[%c0_17, %c0_18] : memref<1x128xf32, #tpu.memory_space<vmem>>, vector<1x128xf32>
    %20 = vector.broadcast %19 : vector<1x128xf32> to vector<8x128xf32>
    %21 = arith.mulf %18, %20 : vector<8x128xf32>
    %cst_19 = arith.constant dense<0.000000e+00> : vector<8xf32>
    %22 = vector.multi_reduction <add>, %21, %cst_19 [1] : vector<8x128xf32> to vector<8xf32>
    %23 = vector.shape_cast %22 : vector<8xf32> to vector<8x1xf32>
    %c0_20 = arith.constant 0 : index
    %c0_21 = arith.constant 0 : index
    %24 = vector.load %arg9[%c0_20, %c0_21] : memref<1x1xf32, #tpu.memory_space<vmem>>, vector<1x1xf32>
    %25 = vector.broadcast %24 : vector<1x1xf32> to vector<8x1xf32>
    %26 = arith.addf %23, %25 : vector<8x1xf32>
    %c0_22 = arith.constant 0 : index
    %c0_23 = arith.constant 0 : index
    %27 = vector.load %arg10[%c0_22, %c0_23] : memref<8x1xf32, #tpu.memory_space<vmem>>, vector<8x1xf32>
    tpu.vector_store %arg10[%c0_22, %c0_23], %26 {strides = array<i32>} : memref<8x1xf32, #tpu.memory_space<vmem>>, vector<8x1xf32>,
    return
  }
  func.func @transform_0(%arg0: i32) -> (i32, i32) {
    %c0_i32 = arith.constant 0 : i32
    %c0_i32_0 = arith.constant 0 : i32
    return %arg0, %c0_i32 : i32, i32
  }
  func.func @transform_1(%arg0: i32) -> (i32, i32) {
    %c0_i32 = arith.constant 0 : i32
    %c0_i32_0 = arith.constant 0 : i32
    return %arg0, %c0_i32 : i32, i32
  }
  func.func @transform_2(%arg0: i32) -> (i32, i32) {
    %c0_i32 = arith.constant 0 : i32
    %c0_i32_0 = arith.constant 0 : i32
    %c0_i32_1 = arith.constant 0 : i32
    return %c0_i32, %c0_i32_0 : i32, i32
  }
  func.func @transform_3(%arg0: i32) -> (i32, i32) {
    %c0_i32 = arith.constant 0 : i32
    %c0_i32_0 = arith.constant 0 : i32
    %c0_i32_1 = arith.constant 0 : i32
    return %c0_i32, %c0_i32_0 : i32, i32
  }
  func.func @transform_4(%arg0: i32) -> (i32, i32) {
    %c0_i32 = arith.constant 0 : i32
    %c0_i32_0 = arith.constant 0 : i32
    %c0_i32_1 = arith.constant 0 : i32
    return %c0_i32, %c0_i32_0 : i32, i32
  }
  func.func @transform_5(%arg0: i32) -> (i32, i32) {
    %c0_i32 = arith.constant 0 : i32
    %c0_i32_0 = arith.constant 0 : i32
    %c0_i32_1 = arith.constant 0 : i32
    return %c0_i32, %c0_i32_0 : i32, i32
  }
  func.func @transform_6(%arg0: i32) -> (i32, i32) {
    %c0_i32 = arith.constant 0 : i32
    %c0_i32_0 = arith.constant 0 : i32
    %c0_i32_1 = arith.constant 0 : i32
    return %c0_i32, %c0_i32_0 : i32, i32
  }
  func.func @transform_7(%arg0: i32) -> (i32, i32) {
    %c0_i32 = arith.constant 0 : i32
    %c0_i32_0 = arith.constant 0 : i32
    %c0_i32_1 = arith.constant 0 : i32
    return %c0_i32, %c0_i32_0 : i32, i32
  }
  func.func @transform_8(%arg0: i32) -> (i32, i32) {
    %c0_i32 = arith.constant 0 : i32
    %c0_i32_0 = arith.constant 0 : i32
    %c0_i32_1 = arith.constant 0 : i32
    return %c0_i32, %c0_i32_0 : i32, i32
  }
  func.func @transform_9(%arg0: i32) -> (i32, i32) {
    %c0_i32 = arith.constant 0 : i32
    %c0_i32_0 = arith.constant 0 : i32
    return %arg0, %c0_i32 : i32, i32
  }
}

</mosaic_0001>

<bundles_post_ra>
// kernel: tpu_custom_call.1
= control target key start
LH: loop header
LB: loop body
LE: loop exit
PB: predicated region body
PF: predicated region fallthrough
CT: control target
= control target key end

     0   :  { %s629_s0 = inlined_call_operand.hbm [shape: f32[8,12], index: 0, kind: input, shape index: {}]   ;;  %s630_s1 = inlined_call_operand.vmem [shape: f32[8,4], index: 1, kind: input, shape index: {}]   ;;  %s631_s2 = inlined_call_operand.vmem [shape: f32[12,128], index: 2, kind: input, shape index: {}]   ;;  %s632_s3 = inlined_call_operand.vmem [shape: f32[4,128], index: 3, kind: input, shape index: {}]   ;;  %s633_s4 = inlined_call_operand.vmem [shape: f32[1,128], index: 4, kind: input, shape index: {}]   ;;  %s634_s5 = inlined_call_operand.hbm [shape: f32[128,128], index: 5, kind: input, shape index: {}]   ;;  %s635_s6 = inlined_call_operand.vmem [shape: f32[1,128], index: 6, kind: input, shape index: {}]   ;;  %s636_s7 = inlined_call_operand.vmem [shape: f32[1,128], index: 7, kind: input, shape index: {}]   ;;  %s637_s8 = inlined_call_operand.<no memory space> [shape: f32[1,1], index: 8, kind: input, shape index: {}]   ;;  %s638_s9 = inlined_call_operand.vmem [shape: f32[8,1], index: 9, kind: output, shape index: {}]  }
   0x1   :  { %v14_v0 = vstv %s637_s8 }
   0x2   :  { %15 = vst [vmem:[#allocation2] sm:$0x1] %v14_v0 }
   0x3   :  { %16 = vsyncpa [#allocation4], 0 }
   0x4   :  { %17 = vsyncpa [#allocation6], 0  ;;  %s510_s11 = smov [#allocation3]   ;;  %s511_s13 = smov [#allocation5]  }
   0x5   :  { %s24_s12 = sshll.u32 %s510_s11, 4  ;;  %s41_s14 = sshll.u32 %s511_s13, 4  ;;  %s25_s12 = int_to_ptr.vmem [resolvable:$true] %s24_s12  ;;  %s571_s14 = int_to_ptr.vmem [resolvable:$true] %s41_s14 }
   0x6   :  { %s462_s17 = scalar_lea.hbm %s629_s0, 128 }
   0x7   :  { %p463_p0 = scmp.ne.s32.totalorder %s629_s0, %s462_s17  ;;  %p466_p1 = scmp.lt.u32.totalorder %s462_s17, %s629_s0 }
   0x9   :  { %p468_p2 = pnand %p466_p1, %p463_p0 }
   0xb   :  { %471 = shalt.err (!%p468_p2)
}
   0xc   :  { %s472_s21 = scalar_lea.vmem %s25_s12, 128  ;;  %p477_p4 = scmp.lt.s32.totalorder %s25_s12, %s25_s12 }
   0xd   :  { %p473_p3 = scmp.ne.s32.totalorder %s25_s12, %s472_s21  ;;  %p478_p5 = scmp.lt.s32.totalorder %s472_s21, %s472_s21 }
   0xf   :  { %p479_p6 = por %p478_p5, %p477_p4 }
  0x11   :  { %p480_p7 = pnand %p479_p6, %p473_p3 }
  0x13   :  { %483 = shalt.err (!%p480_p7)
}
  0x14   :  { %27 = dma.hbm_to_vmem [thread:$0]  %s629_s0, 128, %s25_s12, [#allocation4]  }
  0x15   :  { %s484_s26 = scalar_lea.hbm %s634_s5, 2048 }
  0x16   :  { %p485_p8 = scmp.ne.s32.totalorder %s634_s5, %s484_s26  ;;  %p488_p9 = scmp.lt.u32.totalorder %s484_s26, %s634_s5 }
  0x18   :  { %p490_p10 = pnand %p488_p9, %p485_p8 }
  0x1a   :  { %493 = shalt.err (!%p490_p10)
}
  0x1b   :  { %s494_s10 = scalar_lea.vmem %s571_s14, 2048  ;;  %p499_p12 = scmp.lt.s32.totalorder %s571_s14, %s571_s14 }
  0x1c   :  { %p495_p11 = scmp.ne.s32.totalorder %s571_s14, %s494_s10  ;;  %p500_p13 = scmp.lt.s32.totalorder %s494_s10, %s494_s10 }
  0x1e   :  { %p501_p0 = por %p500_p13, %p499_p12 }
  0x20   :  { %p502_p1 = pnand %p501_p0, %p495_p11 }
  0x22   :  { %505 = shalt.err (!%p502_p1)
}
  0x23   :  { %s512_s0 = smov 128   ;;  %s513_s11 = smov 8  }
  0x24   :  { %47 = dma.hbm_to_vmem [thread:$0]  %s634_s5, 2048, %s571_s14, [#allocation6], %s512_s0, %s512_s0, %s513_s11  }
  0x25   :  { %506 = dma.done.wait [#allocation4], 128  }
  0x26   :  { %507 = vsyncadd [#allocation4], 4294967168 }
  0x27   :  { %508 = dma.done.wait [#allocation6], 2048  }
  0x28   :  { %509 = vsyncadd [#allocation6], 4294965248  ;;  %v514_v1 = vmov 0.0   ;;  %vm515_vm0 = vmmov 0   ;;  %v516_v2 = vmov 0.0|0.0   ;;  %vm69_vm1 = vcmask 1043456  }
  0x29   :  { %379 = vmatprep.subr.mxu1 %v514_v1  ;;  %381 = vmatprep.mubr.msk.f32.mxu1 %vm515_vm0, %v514_v1  ;;  %vm65_vm2 = vcmask 31744   ;;  %v64_v3 = vld [vmem:[%s632_s3] sm:$0xf]  ;;  %vm517_vm3 = vmmov 1   ;;  %v63_v6 = vld [vmem:[%s631_s2 + $0x8] sm:$0xf] }
  0x2a   :  { %430 = vmatprep.subr.bf16.mxu0 %v516_v2  ;;  %423 = vmatprep.mubr.msk.f32.mxu0 %vm515_vm0, %v514_v1  ;;  %v61_v4 = vld [vmem:[%s630_s1] sm:$0xff]  ;;  %vm428_vm4 = vmpackc.low %vm69_vm1, %vm517_vm3  ;;  %v229_v7 = vld [vmem:[#allocation5] sm:$0xff]  ;;  %vm143_vm5 = vcmask 97280   ;;  %vm341_vm6 = vcmask 7168  }
  0x2b   :  { %v62_v5 = vld [vmem:[%s631_s2] sm:$0xff]  ;;  %380 = vmatpush3.msk.msra.mxu1 %vm69_vm1, %v64_v3  ;;  %v230_v9 = vld [vmem:[#allocation5 + $0x8] sm:$0xff]  ;;  %v233_v15 = vld [vmem:[#allocation5 + $0x20] sm:$0xff] }
  0x2c   :  { %382 = vmatmul.mubr.msk.f32.vlgmr.msra.gmra.mrb[0].mxu1 %vm65_vm2, %v61_v4  ;;  %426 = vmatprep.subr.bf16.mxu1 %v516_v2  ;;  %v427_v8 = vpack.c.bf16 %v63_v6, %v62_v5  ;;  %v231_v10 = vld [vmem:[#allocation5 + $0x10] sm:$0xff]  ;;  %v232_v11 = vld [vmem:[#allocation5 + $0x18] sm:$0xff]  ;;  %v431_v12 = vpack.c.bf16 %v230_v9, %v229_v7  ;;  %v234_v16 = vld [vmem:[#allocation5 + $0x28] sm:$0xff] }
  0x2d   :  { %388 = vmatprep.mubr.msk.f32.mxu1 %vm515_vm0, %v514_v1  ;;  %v60_v13 = vld [vmem:[#allocation3] sm:$0xff]  ;;  %v434_v14 = vpack.c.bf16 %v232_v11, %v231_v10  ;;  %v437_v17 = vpack.c.bf16 %v234_v16, %v233_v15  ;;  %v235_v18 = vld [vmem:[#allocation5 + $0x30] sm:$0xff]  ;;  %v237_v21 = vld [vmem:[#allocation5 + $0x40] sm:$0xff] }
  0x2e   :  { %429 = vmatpush3.bf16.msk.msra.mxu1 %vm428_vm4, %v427_v8  ;;  %432 = vmatpush3.bf16.msra.mxu0 %v431_v12  ;;  %v236_v19 = vld [vmem:[#allocation5 + $0x38] sm:$0xff]  ;;  %v238_v22 = vld [vmem:[#allocation5 + $0x48] sm:$0xff]  ;;  %v239_v24 = vld [vmem:[#allocation5 + $0x50] sm:$0xff] }
  0x2f   :  { %433 = vmatprep.subr.bf16.mxu0 %v516_v2  ;;  %v440_v20 = vpack.c.bf16 %v236_v19, %v235_v18  ;;  %v443_v23 = vpack.c.bf16 %v238_v22, %v237_v21  ;;  %v240_v25 = vld [vmem:[#allocation5 + $0x58] sm:$0xff]  ;;  %v241_v27 = vld [vmem:[#allocation5 + $0x60] sm:$0xff]  ;;  %v242_v28 = vld [vmem:[#allocation5 + $0x68] sm:$0xff] }
  0x30   :  { %v446_v26 = vpack.c.bf16 %v240_v25, %v239_v24  ;;  %v449_v29 = vpack.c.bf16 %v242_v28, %v241_v27  ;;  %v243_v30 = vld [vmem:[#allocation5 + $0x70] sm:$0xff]  ;;  %v244_v31 = vld [vmem:[#allocation5 + $0x78] sm:$0xff] }
  0x31   :  { %389 = vmatmul.mubr.msk.f32.vlgmr.msra.gmra.mrb[2].mxu1 %vm143_vm5, %v60_v13  ;;  %v452_v32 = vpack.c.bf16 %v244_v31, %v243_v30  ;;  %v353_v36 = vld [vmem:[%s633_s4] ss:$0 sm:$0xff] }
  0x32   :  { %435 = vmatpush3.bf16.msra.mxu0 %v434_v14  ;;  %v354_v41 = vld [vmem:[%s635_s6] ss:$0 sm:$0xff] }
  0x33   :  { %436 = vmatprep.subr.bf16.mxu0 %v516_v2  ;;  %v355_v45 = vld [vmem:[%s636_s7] ss:$0 sm:$0xff] }
  0x34   :  { %v356_v48 = vld [vmem:[#allocation2] ss:$0 sm:$0xff] }
  0x36   :  { %438 = vmatpush3.bf16.msra.mxu0 %v437_v17 }
  0x37   :  { %439 = vmatprep.subr.bf16.mxu0 %v516_v2 }
  0x3a   :  { %441 = vmatpush3.bf16.msra.mxu0 %v440_v20 }
  0x3b   :  { %442 = vmatprep.subr.bf16.mxu0 %v516_v2 }
  0x3e   :  { %444 = vmatpush3.bf16.msra.mxu0 %v443_v23 }
  0x3f   :  { %445 = vmatprep.subr.bf16.mxu0 %v516_v2 }
  0x42   :  { %447 = vmatpush3.bf16.msra.mxu0 %v446_v26 }
  0x43   :  { %448 = vmatprep.subr.bf16.mxu0 %v516_v2 }
  0x46   :  { %450 = vmatpush3.bf16.msra.mxu0 %v449_v29 }
  0x47   :  { %451 = vmatprep.subr.bf16.mxu0 %v516_v2 }
  0x4a   :  { %453 = vmatpush3.bf16.msra.mxu0 %v452_v32 }
  0xff   :  { %v139_v33 = vpop.f32.mrb[0].mxu1 }
 0x100   :  { %v383_v34 = vpop.f32.mrb[1].mxu1 }
 0x104   :  { %v216_v35 = vpop.f32.mrb[2].mxu1 }
 0x105   :  { %v217_v37 = vadd.f32 %v216_v35, %v139_v33  ;;  %v390_v38 = vpop.f32.mrb[3].mxu1 }
 0x107   :  { %v227_v39 = vadd.f32 %v353_v36, %v217_v37 }
 0x109   :  { %v228_v40 = vmax.f32 %v227_v39, 0.0 }
 0x10b   :  { %424 = vmatmul.mubr.f32.vlgmr.msra.gmra.mrb[0].mxu0 %v228_v40 }
 0x1de   :  { %v318_v42 = vpop.f32.mrb[0].mxu0 }
 0x1df   :  { %v319_v43 = vadd.f32 %v354_v41, %v318_v42  ;;  %v425_v44 = vpop.f32.mrb[1].mxu0 }
 0x1e1   :  { %v322_v46 = vmax.f32 %v319_v43, 0.0 }
 0x1e3   :  { %v330_v47 = vmul.f32 %v355_v45, %v322_v46 }
 0x1e5   :  { %331 = vadd.xlane.f32.xlu0 %v330_v47 }
 0x272   :  { %v332_v49 = vpop.xlane.xlu0 %331 }
 0x273   :  { %v340_v50 = vadd.f32 %v356_v48, %v332_v49 }
 0x275   :  { %342 = vst.msk [vmem:[%s638_s9] sm:$0xff] %vm341_vm6, %v340_v50 }
 0x276   :  { %347 = vsyncpa [#allocation4], 1 }
 0x277   :  { %348 = vsyncpa [#allocation6], 1 }

</bundles_post_ra>
